<compile_context>
chip_gen: v6e
topology: v6e:2x2x1
jax: 0.10.0
libtpu: 0.0.40
codegen_flags: <defaults>
</compile_context>

<pallas_src>
import functools

import jax
import jax.numpy as jnp
from jax.experimental import pallas as pl
from jax.experimental.pallas import tpu as pltpu


def _cdiv(a: int, b: int) -> int:
    return -(-a // b)


def _round_up(a: int, b: int) -> int:
    return _cdiv(a, b) * b


# ---------------------------------------------------------------------------
# Kernels
# ---------------------------------------------------------------------------
def ffn_resident_kernel(x_ref, w1_ref, b1_ref, w2_ref, b2_ref, o_ref):
    # Weights fully VMEM-resident; one grid axis over token tiles.
    # x_ref: (tm, Hp) bf16; w1_ref: (Hp, Fp) bf16; b1_ref: (1, Fp) f32
    # w2_ref: (Fp, Hp) bf16; b2_ref: (1, Hp) f32; o_ref: (tm, Hp)
    h = jnp.dot(x_ref[...], w1_ref[...], preferred_element_type=jnp.float32)
    h = jnp.maximum(h + b1_ref[...], 0.0)
    # (dropout p=0.1 is identity in eval mode)
    y = jnp.dot(h.astype(w2_ref.dtype), w2_ref[...],
                preferred_element_type=jnp.float32)
    o_ref[...] = (y + b2_ref[...]).astype(o_ref.dtype)


def ffn_tiled_kernel(x_ref, w1_ref, b1_ref, w2_ref, b2_ref, o_ref, acc_ref, *, tf):
    # Streaming path: grid = (M tiles, F tiles); persistent f32 accumulator.
    # x_ref: (tm, Hp) bf16; w1_ref: (Hp, tf) bf16; b1_ref: (1, Fp) f32 (resident)
    # w2_ref: (tf, Hp) bf16; b2_ref: (1, Hp) f32;  acc_ref: (tm, Hp) f32 scratch
    f = pl.program_id(1)

    @pl.when(f == 0)
    def _init():
        # Fuse the second bias into the accumulator init instead of an epilogue add.
        acc_ref[...] = jnp.broadcast_to(b2_ref[...], acc_ref.shape).astype(jnp.float32)

    h = jnp.dot(x_ref[...], w1_ref[...], preferred_element_type=jnp.float32)
    start = pl.multiple_of(f * tf, 128)
    h = jnp.maximum(h + b1_ref[:, pl.ds(start, tf)], 0.0)
    # (dropout p=0.1 is identity in eval mode)
    acc_ref[...] += jnp.dot(h.astype(w2_ref.dtype), w2_ref[...],
                            preferred_element_type=jnp.float32)

    @pl.when(f == pl.num_programs(1) - 1)
    def _finalize():
        o_ref[...] = acc_ref[...].astype(o_ref.dtype)


# ---------------------------------------------------------------------------
# Tile selection under a per-device VMEM budget
# ---------------------------------------------------------------------------
def _vmem_budget_bytes() -> int:
    cap = None
    try:
        info = pltpu.get_tpu_info()
        cap = getattr(info, "vmem_capacity_bytes", None)
    except Exception:
        cap = None
    if not cap:
        cap = 64 << 20  # conservative: v7x per-TC physical VMEM
    cap = int(cap)
    return max(cap - (8 << 20), 16 << 20)


def _pick_tm(M, per_row_bytes, avail_bytes, *, even_grid, tm_cap=1024):
    """Largest token tile (mult of 8) fitting `avail_bytes`, with minimal M padding."""
    mp8 = _round_up(max(int(M), 1), 8)
    fit = int(avail_bytes) // max(int(per_row_bytes), 1)
    tm_max = max(8, min(tm_cap, (fit // 8) * 8))
    tm_target = min(tm_max, mp8)
    n_m = _cdiv(mp8, tm_target)
    # Even M-grid helps the "parallel" axis shard across 2 TCs (v7x); only worth
    # it when weights are VMEM-resident (no extra weight streaming cost).
    if even_grid and n_m % 2 == 1 and mp8 >= 256:
        n_m += 1
    tm = _round_up(_cdiv(mp8, n_m), 8)
    return tm, n_m * tm


def _select_config(M, Hp, Fp, out_itemsize, budget, force_tiled=False):
    """Returns (mode, tm, Mp, tf)."""
    # Double-buffered x + out tile bytes per token row.
    xo_row = Hp * (2 * 2 + 2 * out_itemsize)

    # ---- Mode A: weights fully VMEM-resident, single (M) grid axis ----
    w_fixed = 2 * (Hp * Fp * 2) * 2            # W1 + W2 bf16, 2 buffers each
    b_fixed = 2 * 4 * (Fp + Hp)                # b1 + b2 f32, 2 buffers each
    row_res = xo_row + Fp * (4 + 2)            # + (tm, Fp) f32 h and its bf16 copy
    avail_res = budget - w_fixed - b_fixed
    if (not force_tiled) and avail_res >= 8 * row_res:
        tm, Mp = _pick_tm(M, row_res, avail_res, even_grid=True)
        return "resident", tm, Mp, Fp

    # ---- Mode B: stream weights over an F reduction axis, persistent acc ----
    row_base = xo_row + Hp * 4                 # + f32 accumulator row
    nf = Fp // 128
    # tf must be a 128-multiple that divides Fp exactly (no padding inflation).
    tf_cands = [128 * k for k in range(min(nf, 8), 0, -1) if nf % k == 0]
    best = None  # (tm, tf, Mp)
    for tf in tf_cands:
        fixed = 2 * (Hp * tf * 2) * 2 + 2 * 4 * (Fp + Hp)   # W1/W2 tiles + biases
        avail = budget - fixed
        row = row_base + tf * (4 + 2)          # + (tm, tf) f32 h and bf16 copy
        if avail < 8 * row:
            continue
        tm, Mp = _pick_tm(M, row, avail, even_grid=False)
        if best is None or (tm, tf) > (best[0], best[1]):
            best = (tm, tf, Mp)
    if best is None:
        tm, Mp = 8, _round_up(max(int(M), 1), 8)
        best = (tm, 128, Mp)
    return "tiled", best[0], best[2], best[1]


# ---------------------------------------------------------------------------
# Wrapper
# ---------------------------------------------------------------------------
@functools.partial(jax.jit, static_argnames=("force_tiled",))
def ffn_pallas(x, w1p, b1p, w2p, b2p, *, force_tiled=False):
    """x: (..., H). w1p/b1p/w2p/b2p are pre-padded params from prepare_ffn_params."""
    out_dtype = x.dtype
    H = x.shape[-1]
    Hp, Fp = w1p.shape
    lead = x.shape[:-1]
    x2 = x.reshape(-1, H)
    M = x2.shape[0]

    budget = _vmem_budget_bytes()
    mode, tm, Mp, tf = _select_config(M, Hp, Fp, jnp.dtype(out_dtype).itemsize,
                                      budget, force_tiled=force_tiled)
    n_m = Mp // tm

    xb = x2.astype(jnp.bfloat16)
    if Mp != M or Hp != H:
        xp = jnp.zeros((Mp, Hp), jnp.bfloat16).at[:M, :H].set(xb)
    else:
        xp = xb

    vmem_limit = int(min(budget, 128 << 20))

    if mode == "resident":
        grid = (n_m,)
        in_specs = [
            pl.BlockSpec((tm, Hp), lambda i: (i, 0)),    # x tile
            pl.BlockSpec((Hp, Fp), lambda i: (0, 0)),    # W1 resident
            pl.BlockSpec((1, Fp), lambda i: (0, 0)),     # b1 resident
            pl.BlockSpec((Fp, Hp), lambda i: (0, 0)),    # W2 resident
            pl.BlockSpec((1, Hp), lambda i: (0, 0)),     # b2 resident
        ]
        out_specs = pl.BlockSpec((tm, Hp), lambda i: (i, 0))
        scratch = []
        kernel = ffn_resident_kernel
        semantics = ("parallel",)
    else:
        n_f = Fp // tf
        grid = (n_m, n_f)
        in_specs = [
            pl.BlockSpec((tm, Hp), lambda i, f: (i, 0)),   # x tile (revisited over F)
            pl.BlockSpec((Hp, tf), lambda i, f: (0, f)),   # W1 tile
            pl.BlockSpec((1, Fp), lambda i, f: (0, 0)),    # b1 resident, sliced in-kernel
            pl.BlockSpec((tf, Hp), lambda i, f: (f, 0)),   # W2 tile
            pl.BlockSpec((1, Hp), lambda i, f: (0, 0)),    # b2 resident
        ]
        out_specs = pl.BlockSpec((tm, Hp), lambda i, f: (i, 0))
        scratch = [pltpu.VMEM((tm, Hp), jnp.float32)]
        kernel = functools.partial(ffn_tiled_kernel, tf=tf)
        semantics = ("parallel", "arbitrary")

    out = pl.pallas_call(
        kernel,
        out_shape=jax.ShapeDtypeStruct((Mp, Hp), out_dtype),
        grid_spec=pltpu.PrefetchScalarGridSpec(
            num_scalar_prefetch=0,
            grid=grid,
            in_specs=in_specs,
            out_specs=out_specs,
            scratch_shapes=scratch,
        ),
        compiler_params=pltpu.CompilerParams(
            dimension_semantics=semantics,
            vmem_limit_bytes=vmem_limit,
        ),
    )(xp, w1p, b1p, w2p, b2p)

    return out[:M, :H].reshape(*lead, H)


# ---------------------------------------------------------------------------
# Parameter init / one-time padding (hoisted out of the per-call path)
# ---------------------------------------------------------------------------
def init_ffn_params(key, hidden_size, ff_size, dtype=jnp.float32):
    """Deterministic init mimicking nn.Linear defaults: U(-1/sqrt(in), 1/sqrt(in))."""
    k1, k2, k3, k4 = jax.random.split(key, 4)
    bound1 = 1.0 / (hidden_size ** 0.5)
    bound2 = 1.0 / (ff_size ** 0.5)
    # PyTorch Linear weight is (out, in); store transposed (in, out) for the kernel.
    w1_t = jax.random.uniform(k1, (hidden_size, ff_size), dtype, -bound1, bound1)
    b1 = jax.random.uniform(k2, (ff_size,), dtype, -bound1, bound1)
    w2_t = jax.random.uniform(k3, (ff_size, hidden_size), dtype, -bound2, bound2)
    b2 = jax.random.uniform(k4, (hidden_size,), dtype, -bound2, bound2)
    return w1_t, b1, w2_t, b2


def prepare_ffn_params(w1_t, b1, w2_t, b2):
    """One-time lane-pad (multiples of 128) + bf16 cast of the weights."""
    H, F = w1_t.shape
    Hp, Fp = _round_up(H, 128), _round_up(F, 128)
    w1p = jnp.zeros((Hp, Fp), jnp.bfloat16).at[:H, :F].set(w1_t.astype(jnp.bfloat16))
    b1p = jnp.zeros((1, Fp), jnp.float32).at[:, :F].set(
        b1.astype(jnp.float32).reshape(1, F))
    w2p = jnp.zeros((Fp, Hp), jnp.bfloat16).at[:F, :H].set(w2_t.astype(jnp.bfloat16))
    b2p = jnp.zeros((1, Hp), jnp.float32).at[:, :H].set(
        b2.astype(jnp.float32).reshape(1, H))
    return w1p, b1p, w2p, b2p


if __name__ == "__main__":
    batch, seq, hidden, ff = 2, 8, 32, 64

    key = jax.random.PRNGKey(0)
    kx, kp = jax.random.split(key)
    x = jax.random.normal(kx, (batch, seq, hidden), dtype=jnp.float32)
    w1_t, b1, w2_t, b2 = init_ffn_params(kp, hidden, ff)
    params = prepare_ffn_params(w1_t, b1, w2_t, b2)   # one-time pad + bf16 cast

    # Exercise both code paths (weights-resident fast path and F-streaming path).
    y_res = jax.block_until_ready(ffn_pallas(x, *params))
    y_til = jax.block_until_ready(ffn_pallas(x, *params, force_tiled=True))
    assert y_res.shape == x.shape and y_til.shape == x.shape

    # Reference mirroring the kernel's numerics: bf16 matmul inputs, f32 accum,
    # bias + ReLU in f32, eval-mode dropout == identity.
    xb = x.reshape(-1, hidden).astype(jnp.bfloat16)
    h = jnp.maximum(
        jnp.dot(xb, w1_t.astype(jnp.bfloat16), preferred_element_type=jnp.float32)
        + b1, 0.0)
    ref = jnp.dot(h.astype(jnp.bfloat16), w2_t.astype(jnp.bfloat16),
                  preferred_element_type=jnp.float32) + b2
    ref = ref.reshape(x.shape)

    assert jnp.allclose(y_res, ref, atol=2e-2, rtol=2e-2), \
        float(jnp.max(jnp.abs(y_res - ref)))
    assert jnp.allclose(y_til, ref, atol=2e-2, rtol=2e-2), \
        float(jnp.max(jnp.abs(y_til - ref)))

    print("KERNEL_OK")
</pallas_src>

<mosaic_0001>
module attributes {stable_mosaic.version = 11 : i64} {
  func.func @ffn_resident_kernel(%arg0: i32, %arg1: memref<16x128xbf16, #tpu.memory_space<vmem>>, %arg2: memref<128x128xbf16, #tpu.memory_space<vmem>>, %arg3: memref<1x128xf32, #tpu.memory_space<vmem>>, %arg4: memref<128x128xbf16, #tpu.memory_space<vmem>>, %arg5: memref<1x128xf32, #tpu.memory_space<vmem>>, %arg6: memref<16x128xf32, #tpu.memory_space<vmem>>) attributes {dimension_semantics = [#tpu.dimension_semantics<parallel>], iteration_bounds = array<i64: 1>, scalar_prefetch = 0 : i64, scratch_operands = 0 : i64, tpu.core_type = #tpu.core_type<tc>, window_params = [{transform_indices = @transform_0, window_bounds = array<i64: 16, 128>}, {pipeline_mode = #tpu.pipeline_mode<synchronous>, transform_indices = @transform_1, window_bounds = array<i64: 128, 128>}, {pipeline_mode = #tpu.pipeline_mode<synchronous>, transform_indices = @transform_2, window_bounds = array<i64: 1, 128>}, {pipeline_mode = #tpu.pipeline_mode<synchronous>, transform_indices = @transform_3, window_bounds = array<i64: 128, 128>}, {pipeline_mode = #tpu.pipeline_mode<synchronous>, transform_indices = @transform_4, window_bounds = array<i64: 1, 128>}, {transform_indices = @transform_5, window_bounds = array<i64: 16, 128>}]} {
    %c0 = arith.constant 0 : index
    %c0_0 = arith.constant 0 : index
    %0 = vector.load %arg1[%c0, %c0_0] : memref<16x128xbf16, #tpu.memory_space<vmem>>, vector<16x128xbf16>
    %c0_1 = arith.constant 0 : index
    %c0_2 = arith.constant 0 : index
    %1 = vector.load %arg2[%c0_1, %c0_2] : memref<128x128xbf16, #tpu.memory_space<vmem>>, vector<128x128xbf16>
    %cst = arith.constant dense<0.000000e+00> : vector<16x128xf32>
    %2 = tpu.matmul %0, %1, %cst {dimension_numbers = #tpu.dot_dimension_numbers<[1], [0], [0], [1], [0, 0, 1, 1], [], []>} : vector<16x128xbf16>, vector<128x128xbf16>, vector<16x128xf32> -> vector<16x128xf32>
    %c0_3 = arith.constant 0 : index
    %c0_4 = arith.constant 0 : index
    %3 = vector.load %arg3[%c0_3, %c0_4] : memref<1x128xf32, #tpu.memory_space<vmem>>, vector<1x128xf32>
    %4 = vector.broadcast %3 : vector<1x128xf32> to vector<16x128xf32>
    %5 = arith.addf %2, %4 : vector<16x128xf32>
    %cst_5 = arith.constant 0.000000e+00 : f32
    %6 = vector.broadcast %cst_5 : f32 to vector<16x128xf32>
    %7 = arith.maximumf %5, %6 : vector<16x128xf32>
    %8 = arith.truncf %7 : vector<16x128xf32> to vector<16x128xbf16>
    %c0_6 = arith.constant 0 : index
    %c0_7 = arith.constant 0 : index
    %9 = vector.load %arg4[%c0_6, %c0_7] : memref<128x128xbf16, #tpu.memory_space<vmem>>, vector<128x128xbf16>
    %cst_8 = arith.constant dense<0.000000e+00> : vector<16x128xf32>
    %10 = tpu.matmul %8, %9, %cst_8 {dimension_numbers = #tpu.dot_dimension_numbers<[1], [0], [0], [1], [0, 0, 1, 1], [], []>} : vector<16x128xbf16>, vector<128x128xbf16>, vector<16x128xf32> -> vector<16x128xf32>
    %c0_9 = arith.constant 0 : index
    %c0_10 = arith.constant 0 : index
    %11 = vector.load %arg5[%c0_9, %c0_10] : memref<1x128xf32, #tpu.memory_space<vmem>>, vector<1x128xf32>
    %12 = vector.broadcast %11 : vector<1x128xf32> to vector<16x128xf32>
    %13 = arith.addf %10, %12 : vector<16x128xf32>
    %c0_11 = arith.constant 0 : index
    %c0_12 = arith.constant 0 : index
    %14 = vector.load %arg6[%c0_11, %c0_12] : memref<16x128xf32, #tpu.memory_space<vmem>>, vector<16x128xf32>
    tpu.vector_store %arg6[%c0_11, %c0_12], %13 {strides = array<i32>} : memref<16x128xf32, #tpu.memory_space<vmem>>, vector<16x128xf32>,
    return
  }
  func.func @transform_0(%arg0: i32) -> (i32, i32) {
    %c0_i32 = arith.constant 0 : i32
    %c0_i32_0 = arith.constant 0 : i32
    return %arg0, %c0_i32 : i32, i32
  }
  func.func @transform_1(%arg0: i32) -> (i32, i32) {
    %c0_i32 = arith.constant 0 : i32
    %c0_i32_0 = arith.constant 0 : i32
    %c0_i32_1 = arith.constant 0 : i32
    return %c0_i32, %c0_i32_0 : i32, i32
  }
  func.func @transform_2(%arg0: i32) -> (i32, i32) {
    %c0_i32 = arith.constant 0 : i32
    %c0_i32_0 = arith.constant 0 : i32
    %c0_i32_1 = arith.constant 0 : i32
    return %c0_i32, %c0_i32_0 : i32, i32
  }
  func.func @transform_3(%arg0: i32) -> (i32, i32) {
    %c0_i32 = arith.constant 0 : i32
    %c0_i32_0 = arith.constant 0 : i32
    %c0_i32_1 = arith.constant 0 : i32
    return %c0_i32, %c0_i32_0 : i32, i32
  }
  func.func @transform_4(%arg0: i32) -> (i32, i32) {
    %c0_i32 = arith.constant 0 : i32
    %c0_i32_0 = arith.constant 0 : i32
    %c0_i32_1 = arith.constant 0 : i32
    return %c0_i32, %c0_i32_0 : i32, i32
  }
  func.func @transform_5(%arg0: i32) -> (i32, i32) {
    %c0_i32 = arith.constant 0 : i32
    %c0_i32_0 = arith.constant 0 : i32
    return %arg0, %c0_i32 : i32, i32
  }
}

</mosaic_0001>

<bundles_post_ra>
// kernel: ffn_pallas.1
= control target key start
LH: loop header
LB: loop body
LE: loop exit
PB: predicated region body
PF: predicated region fallthrough
CT: control target
= control target key end

     0   :  { %10 = vsyncpa [#allocation3], 0  ;;  %s493_s0 = inlined_call_operand.vmem [shape: bf16[16,128], index: 0, kind: input, shape index: {}]   ;;  %s494_s1 = inlined_call_operand.hbm [shape: bf16[128,128], index: 1, kind: input, shape index: {}]   ;;  %s495_s2 = inlined_call_operand.vmem [shape: f32[1,128], index: 2, kind: input, shape index: {}]   ;;  %s496_s3 = inlined_call_operand.hbm [shape: bf16[128,128], index: 3, kind: input, shape index: {}]   ;;  %s497_s4 = inlined_call_operand.vmem [shape: f32[1,128], index: 4, kind: input, shape index: {}]   ;;  %s498_s5 = inlined_call_operand.vmem [shape: f32[16,128], index: 5, kind: output, shape index: {}]  }
   0x1   :  { %11 = vsyncpa [#allocation5], 0  ;;  %s436_s18 = smov [#allocation2]  }
   0x2   :  { %s19_s19 = sshll.u32 %s436_s18, 4  ;;  %s20_s19 = int_to_ptr.vmem [resolvable:$true] %s19_s19 }
   0x3   :  { %s400_s20 = scalar_lea.vmem %s20_s19, 1024  ;;  %p405_p1 = scmp.lt.s32.totalorder %s20_s19, %s20_s19 }
   0x4   :  { %p401_p0 = scmp.ne.s32.totalorder %s20_s19, %s400_s20  ;;  %p406_p2 = scmp.lt.s32.totalorder %s400_s20, %s400_s20 }
   0x6   :  { %p407_p3 = por %p406_p2, %p405_p1 }
   0x8   :  { %p408_p4 = pnand %p407_p3, %p401_p0 }
   0xa   :  { %411 = shalt.err (!%p408_p4)
}
   0xb   :  { %s437_s21 = smov 64   ;;  %s438_s22 = smov 4  }
   0xc   :  { %25 = dma.hbm_to_vmem [thread:$0]  %s494_s1, 1024, %s20_s19, [#allocation3], %s437_s21, %s437_s21, %s438_s22  }
   0xd   :  { %s439_s25 = smov [#allocation4]  }
   0xe   :  { %s33_s26 = sshll.u32 %s439_s25, 4  ;;  %s34_s26 = int_to_ptr.vmem [resolvable:$true] %s33_s26 }
   0xf   :  { %s420_s27 = scalar_lea.vmem %s34_s26, 1024  ;;  %p425_p6 = scmp.lt.s32.totalorder %s34_s26, %s34_s26 }
  0x10   :  { %p421_p5 = scmp.ne.s32.totalorder %s34_s26, %s420_s27  ;;  %p426_p7 = scmp.lt.s32.totalorder %s420_s27, %s420_s27 }
  0x12   :  { %p427_p8 = por %p426_p7, %p425_p6 }
  0x14   :  { %p428_p9 = pnand %p427_p8, %p421_p5 }
  0x16   :  { %431 = shalt.err (!%p428_p9)
}
  0x17   :  { %39 = dma.hbm_to_vmem [thread:$0]  %s496_s3, 1024, %s34_s26, [#allocation5], %s437_s21, %s437_s21, %s438_s22  }
  0x18   :  { %432 = dma.done.wait [#allocation3], 1024  }
  0x19   :  { %433 = vsyncadd [#allocation3], 4294966272 }
  0x1a   :  { %434 = dma.done.wait [#allocation5], 1024  }
  0x1b   :  { %435 = vsyncadd [#allocation5], 4294966272  ;;  %v440_v0 = vmov 0.0   ;;  %vm441_vm0 = vmmov 0   ;;  %v375_v1 = vld [vmem:[#allocation2 + $0x38] sm:$0xff]   ;;  %v376_v2 = vld [vmem:[#allocation2 + $0x30] sm:$0xff]  }
  0x1c   :  { %329 = vmatprep.subr.bf16.mxu0 %v440_v0  ;;  %345 = vmatprep.mubr.msk.bf16.mxu0 %vm441_vm0, %v440_v0  ;;  %v377_v3 = vld [vmem:[#allocation2 + $0x28] sm:$0xff]   ;;  %v384_v4 = vld [vmem:[#allocation4 + $0x38] sm:$0xff]   ;;  %v378_v5 = vld [vmem:[#allocation2 + $0x20] sm:$0xff]  }
  0x1d   :  { %349 = vmatprep.subr.bf16.mxu1 %v440_v0  ;;  %365 = vmatprep.mubr.msk.bf16.mxu1 %vm441_vm0, %v440_v0  ;;  %v385_v6 = vld [vmem:[#allocation4 + $0x30] sm:$0xff]   ;;  %v379_v7 = vld [vmem:[#allocation2 + $0x18] sm:$0xff]   ;;  %v386_v8 = vld [vmem:[#allocation4 + $0x28] sm:$0xff]  }
  0x1e   :  { %330 = vmatpush3.bf16.msra.mxu0 %v375_v1  ;;  %350 = vmatpush3.bf16.msra.mxu1 %v384_v4  ;;  %v380_v9 = vld [vmem:[#allocation2 + $0x10] sm:$0xff]   ;;  %v387_v10 = vld [vmem:[#allocation4 + $0x20] sm:$0xff]   ;;  %v381_v11 = vld [vmem:[#allocation2 + $0x8] sm:$0xff]  }
  0x1f   :  { %331 = vmatprep.subr.bf16.mxu0 %v440_v0  ;;  %351 = vmatprep.subr.bf16.mxu1 %v440_v0  ;;  %v388_v12 = vld [vmem:[#allocation4 + $0x18] sm:$0xff]   ;;  %v382_v13 = vld [vmem:[#allocation2] sm:$0xff]   ;;  %v389_v15 = vld [vmem:[#allocation4 + $0x10] sm:$0xff]  }
  0x20   :  { %v383_v14 = vld [vmem:[%s493_s0] sm:$0xff]   ;;  %v390_v16 = vld [vmem:[#allocation4 + $0x8] sm:$0xff]  }
  0x21   :  { %v391_v17 = vld [vmem:[#allocation4] sm:$0xff]  }
  0x22   :  { %332 = vmatpush3.bf16.msra.mxu0 %v376_v2  ;;  %352 = vmatpush3.bf16.msra.mxu1 %v385_v6  ;;  %v292_v18 = vld [vmem:[%s495_s2] ss:$0 sm:$0xff] }
  0x23   :  { %333 = vmatprep.subr.bf16.mxu0 %v440_v0  ;;  %353 = vmatprep.subr.bf16.mxu1 %v440_v0  ;;  %v302_v28 = vld [vmem:[%s497_s4] ss:$0 sm:$0xff] }
  0x26   :  { %334 = vmatpush3.bf16.msra.mxu0 %v377_v3  ;;  %354 = vmatpush3.bf16.msra.mxu1 %v386_v8 }
  0x27   :  { %335 = vmatprep.subr.bf16.mxu0 %v440_v0  ;;  %355 = vmatprep.subr.bf16.mxu1 %v440_v0 }
  0x2a   :  { %336 = vmatpush3.bf16.msra.mxu0 %v378_v5  ;;  %356 = vmatpush3.bf16.msra.mxu1 %v387_v10 }
  0x2b   :  { %337 = vmatprep.subr.bf16.mxu0 %v440_v0  ;;  %357 = vmatprep.subr.bf16.mxu1 %v440_v0 }
  0x2e   :  { %338 = vmatpush3.bf16.msra.mxu0 %v379_v7  ;;  %358 = vmatpush3.bf16.msra.mxu1 %v388_v12 }
  0x2f   :  { %339 = vmatprep.subr.bf16.mxu0 %v440_v0  ;;  %359 = vmatprep.subr.bf16.mxu1 %v440_v0 }
  0x32   :  { %340 = vmatpush3.bf16.msra.mxu0 %v380_v9  ;;  %360 = vmatpush3.bf16.msra.mxu1 %v389_v15 }
  0x33   :  { %341 = vmatprep.subr.bf16.mxu0 %v440_v0  ;;  %361 = vmatprep.subr.bf16.mxu1 %v440_v0 }
  0x36   :  { %342 = vmatpush3.bf16.msra.mxu0 %v381_v11  ;;  %362 = vmatpush3.bf16.msra.mxu1 %v390_v16 }
  0x37   :  { %343 = vmatprep.subr.bf16.mxu0 %v440_v0  ;;  %363 = vmatprep.subr.bf16.mxu1 %v440_v0 }
  0x3a   :  { %344 = vmatpush3.bf16.msra.mxu0 %v382_v13  ;;  %364 = vmatpush3.bf16.msra.mxu1 %v391_v17 }
  0x3d   :  { %346 = vmatmul.mubr.bf16.vlgmr.msra.gmra.mxu0 %v383_v14 }
  0xfd   :  { %v162_v19 = vpop.f32.mrf.mxu0 }
  0xfe   :  { %v163_v21 = vadd.f32 %v292_v18, %v162_v19 }
  0xff   :  { %v347_v20 = vpop.f32.mrf.mxu0 }
 0x100   :  { %v169_v25 = vmax.f32 %v163_v21, 0.0 }
 0x101   :  { %v165_v22 = vpop.f32.mrf.mxu0 }
 0x102   :  { %v166_v23 = vadd.f32 %v292_v18, %v165_v22 }
 0x103   :  { %v348_v24 = vpop.f32.mrf.mxu0 }
 0x104   :  { %v170_v26 = vmax.f32 %v166_v23, 0.0 }
 0x106   :  { %v171_v27 = vpack.c.bf16 %v170_v26, %v169_v25 }
 0x108   :  { %366 = vmatmul.mubr.bf16.vlgmr.msra.gmra.mxu1 %v171_v27 }
 0x1c8   :  { %v277_v29 = vpop.f32.mrf.mxu1 }
 0x1c9   :  { %v278_v30 = vadd.f32 %v302_v28, %v277_v29 }
 0x1ca   :  { %v367_v31 = vpop.f32.mrf.mxu1 }
 0x1cb   :  { %284 = vst [vmem:[%s498_s5] sm:$0xff] %v278_v30 }
 0x1cc   :  { %v280_v32 = vpop.f32.mrf.mxu1 }
 0x1cd   :  { %v281_v33 = vadd.f32 %v302_v28, %v280_v32 }
 0x1ce   :  { %v368_v34 = vpop.f32.mrf.mxu1 }
 0x1cf   :  { %285 = vst [vmem:[%s498_s5 + $0x8] sm:$0xff] %v281_v33 }
 0x1d0   :  { %290 = vsyncpa [#allocation3], 1 }
 0x1d1   :  { %291 = vsyncpa [#allocation5], 1 }

</bundles_post_ra>
